<compile_context>
chip_gen: v7x
topology: tpu7x:2x2x1
jax: 0.10.0
libtpu: 0.0.40
codegen_flags: <defaults>
</compile_context>

<pallas_src>
import functools

import jax
import jax.numpy as jnp
import numpy as np
from jax import lax
from jax.experimental import pallas as pl
from jax.experimental.pallas import tpu as pltpu


def _round_up(v, m):
    return ((v + m - 1) // m) * m


# ----------------------------------------------------------------------------
# Effective-weight computation (wrapper-side: one-time, tiny, elementwise).
# ----------------------------------------------------------------------------
def _l2_normalize(v, eps=1e-12):
    return v / jnp.maximum(jnp.linalg.norm(v, axis=0, keepdims=True), eps)


def _spectral_norm_weight(weight, key, num_iterations=1, epsilon=1e-12):
    # TODO(synk): torch initialises u, v with torch.randn (non-deterministic);
    # a fixed JAX PRNG key is used here, so alpha < 0 cannot bit-match torch.
    sign_w = jnp.sign(weight)
    w_abs = jnp.abs(weight)
    w_mat = w_abs.reshape(w_abs.shape[0], -1)
    ku, kv = jax.random.split(key)
    u = jax.random.normal(ku, (w_mat.shape[0], 1), dtype=weight.dtype)
    v = jax.random.normal(kv, (w_mat.shape[1], 1), dtype=weight.dtype)
    for _ in range(num_iterations):
        v = _l2_normalize(w_mat.T @ u)
        u = _l2_normalize(w_mat @ v)
    sigma = jnp.maximum(u.T @ (w_mat @ v), epsilon)
    w_norm = w_abs / sigma
    exponent = jnp.minimum(1.0 + w_norm.reshape(weight.shape), 10.0)
    return sign_w * jnp.power(w_abs, exponent)


def _effective_weight(weight, alpha):
    if alpha < 0:
        return _spectral_norm_weight(weight, jax.random.PRNGKey(1))
    if alpha == 1.0:
        return weight
    return jnp.sign(weight) * jnp.power(jnp.abs(weight), alpha)


# ----------------------------------------------------------------------------
# Pallas kernel: per-tap conv accumulation for a tile of b_tile images.
#   x_ref : (b_tile, C_in, L)       zero-padded flat images (L lane-padded)
#   w_ref : (k*k, C_out, C_in)      effective weight, tap-major
#   o_ref : (b_tile, C_out, p_pad)  output slab (p_pad = 128-multiple)
# ----------------------------------------------------------------------------
def _conv_taps_kernel(x_ref, w_ref, o_ref, *, b_tile, k, wp, p_pad):
    # Hoist the loop-invariant per-tap weight loads once per grid step.
    w_taps = [w_ref[t] for t in range(k * k)]

    def per_image(i, carry):
        x_i = x_ref[i]                                  # (C_in, L)
        acc = None
        for kh in range(k):
            for kw in range(k):
                off = kh * wp + kw                      # static shift per tap
                d = jnp.dot(w_taps[kh * k + kw], x_i[:, off:off + p_pad],
                            preferred_element_type=jnp.float32)
                acc = d if acc is None else acc + d
        o_ref[i] = acc.astype(o_ref.dtype)              # full, unmasked store
        return carry

    lax.fori_loop(0, b_tile, per_image, 0, unroll=True)


# ----------------------------------------------------------------------------
# Wrapper
# ----------------------------------------------------------------------------
def powerprop_conv2d(x, weight, alpha, mask=None, bias=None, *, padding=1,
                     stride=1, dilation=1, groups=1, b_tile=None,
                     bf16_matmul=False):
    """PowerPropConv2D forward.

    x:      (N, C_in, H, W) float32 (NCHW)
    weight: (C_out, C_in, K, K)
    mask:   optional, same shape as weight
    bias:   optional, (C_out,)
    """
    # TODO(synk): stride/dilation/groups != 1 are not implemented (module
    # defaults are 1/1/1); only square kernels / symmetric int padding.
    assert stride in (1, (1, 1)) and dilation in (1, (1, 1)) and groups == 1
    assert isinstance(padding, int)

    n, c_in, height, width = x.shape
    c_out, c_in_w, kh_, kw_ = weight.shape
    assert c_in == c_in_w and kh_ == kw_
    k = kh_
    pad = padding

    # --- effective weight (wrapper-side, per review) -------------------------
    w_eff = _effective_weight(weight.astype(jnp.float32), float(alpha))
    if mask is not None:
        w_eff = w_eff * mask.astype(jnp.float32)
    # (O, I, Kh, Kw) -> (Kh*Kw, O, I); tap order matches the in-kernel offsets.
    w2 = jnp.transpose(w_eff, (2, 3, 0, 1)).reshape(k * k, c_out, c_in)

    # --- geometry -------------------------------------------------------------
    hp, wp = height + 2 * pad, width + 2 * pad
    h_out, w_out = hp - k + 1, wp - k + 1
    p_len = h_out * wp                       # valid output lanes per image
    p_pad = _round_up(p_len, 128)            # lane-dense output width
    off_max = (k - 1) * wp + (k - 1)
    l_flat = _round_up(max(hp * wp, off_max + p_pad), 128)

    # --- batch tiling / megacore split ---------------------------------------
    if b_tile is None:
        # Target >= ~8 grid steps so each v7x core gets several sequential
        # steps; cap the tile so a step stays comfortably inside VMEM.
        b_tile = max(1, min(8, (n + 7) // 8))
    num_tiles = pl.cdiv(n, b_tile)
    n_groups = 2 if num_tiles >= 2 else 1
    num_tiles = _round_up(num_tiles, n_groups)   # even #steps -> balanced split
    n_pad = num_tiles * b_tile

    # --- input prep: batch pad + spatial halo + lane pad (one jnp.pad each) ---
    x_p = jnp.pad(x.astype(jnp.float32),
                  ((0, n_pad - n), (0, 0), (pad, pad), (pad, pad)))
    x_flat = x_p.reshape(n_pad, c_in, hp * wp)
    x_flat = jnp.pad(x_flat, ((0, 0), (0, 0), (0, l_flat - hp * wp)))

    if bf16_matmul:
        # Opt-in for non-toy shapes on v6e/v7x (halves operand bytes, native
        # bf16 MXU); accumulation stays f32 via preferred_element_type.
        x_flat = x_flat.astype(jnp.bfloat16)
        w2 = w2.astype(jnp.bfloat16)

    kernel = functools.partial(_conv_taps_kernel, b_tile=b_tile, k=k, wp=wp,
                               p_pad=p_pad)

    out_flat = pl.pallas_call(
        kernel,
        out_shape=jax.ShapeDtypeStruct((n_pad, c_out, p_pad), jnp.float32),
        grid=(num_tiles,),
        in_specs=[
            pl.BlockSpec((b_tile, c_in, l_flat), lambda t: (t, 0, 0)),
            pl.BlockSpec((k * k, c_out, c_in), lambda t: (0, 0, 0)),
        ],
        out_specs=pl.BlockSpec((b_tile, c_out, p_pad), lambda t: (t, 0, 0)),
        compiler_params=pltpu.CompilerParams(
            dimension_semantics=("parallel",)),
    )(x_flat, w2)

    # Strip lane padding, halo columns and batch padding (layout plumbing).
    out = out_flat[:n, :, :p_len].reshape(n, c_out, h_out, wp)[:, :, :, :w_out]
    out = out.astype(x.dtype)
    if bias is not None:
        out = out + bias.reshape(1, c_out, 1, 1).astype(out.dtype)
    return out


# ----------------------------------------------------------------------------
# Reference + self-test
# ----------------------------------------------------------------------------
def _reference(x, weight, alpha, mask=None, bias=None, padding=1):
    w = _effective_weight(weight.astype(jnp.float32), float(alpha))
    if mask is not None:
        w = w * mask.astype(jnp.float32)
    out = jax.lax.conv_general_dilated(
        x, w, window_strides=(1, 1), padding=[(padding, padding)] * 2,
        dimension_numbers=("NCHW", "OIHW", "NCHW"),
        precision=jax.lax.Precision.HIGHEST)
    if bias is not None:
        out = out + bias.reshape(1, -1, 1, 1)
    return out


if __name__ == "__main__":
    alpha = 2.0
    batch, in_channels, out_channels, kernel_size = 2, 4, 8, 3
    height, width = 16, 16

    key = jax.random.PRNGKey(0)
    kx, kw_, km, kb, kbias = jax.random.split(key, 5)
    x = jax.random.normal(kx, (batch, in_channels, height, width),
                          dtype=jnp.float32)
    weight = 0.1 * jax.random.normal(
        kw_, (out_channels, in_channels, kernel_size, kernel_size),
        dtype=jnp.float32)
    mask = (jax.random.uniform(km, weight.shape) > 0.5).astype(jnp.float32)
    bias = 0.1 * jax.random.normal(kbias, (out_channels,), dtype=jnp.float32)

    # alpha=2 path, no mask
    out = jax.block_until_ready(powerprop_conv2d(x, weight, alpha))
    ref = _reference(x, weight, alpha)
    np.testing.assert_allclose(np.asarray(out), np.asarray(ref),
                               rtol=1e-4, atol=1e-5)

    # mask path
    out_m = jax.block_until_ready(powerprop_conv2d(x, weight, alpha, mask=mask))
    ref_m = _reference(x, weight, alpha, mask=mask)
    np.testing.assert_allclose(np.asarray(out_m), np.asarray(ref_m),
                               rtol=1e-4, atol=1e-5)

    # larger batch: exercises b_tile > 1, batch padding, even megacore split,
    # alpha == 1 identity path and the bias add.
    xb = jax.random.normal(kb, (13, in_channels, height, width),
                           dtype=jnp.float32)
    out_b = jax.block_until_ready(
        powerprop_conv2d(xb, weight, 1.0, bias=bias, b_tile=4))
    ref_b = _reference(xb, weight, 1.0, bias=bias)
    np.testing.assert_allclose(np.asarray(out_b), np.asarray(ref_b),
                               rtol=1e-4, atol=1e-5)

    print("KERNEL_OK")
</pallas_src>

<mosaic_0001>
module attributes {stable_mosaic.version = 11 : i64} {
  func.func @_conv_taps_kernel(%arg0: i32, %arg1: memref<1x4x512xf32, #tpu.memory_space<vmem>>, %arg2: memref<9x8x4xf32, #tpu.memory_space<vmem>>, %arg3: memref<1x8x384xf32, #tpu.memory_space<vmem>>) attributes {dimension_semantics = [#tpu.dimension_semantics<parallel>], iteration_bounds = array<i64: 2>, scalar_prefetch = 0 : i64, scratch_operands = 0 : i64, tpu.core_type = #tpu.core_type<tc>, window_params = [{transform_indices = @transform_0, window_bounds = array<i64: 1, 4, 512>}, {pipeline_mode = #tpu.pipeline_mode<synchronous>, transform_indices = @transform_1, window_bounds = array<i64: 9, 8, 4>}, {transform_indices = @transform_2, window_bounds = array<i64: 1, 8, 384>}]} {
    %c0 = arith.constant 0 : index
    %c0_0 = arith.constant 0 : index
    %c0_1 = arith.constant 0 : index
    %0 = vector.load %arg2[%c0, %c0_0, %c0_1] : memref<9x8x4xf32, #tpu.memory_space<vmem>>, vector<1x8x4xf32>
    %1 = vector.shape_cast %0 : vector<1x8x4xf32> to vector<8x4xf32>
    %c1 = arith.constant 1 : index
    %c0_2 = arith.constant 0 : index
    %c0_3 = arith.constant 0 : index
    %2 = vector.load %arg2[%c1, %c0_2, %c0_3] : memref<9x8x4xf32, #tpu.memory_space<vmem>>, vector<1x8x4xf32>
    %3 = vector.shape_cast %2 : vector<1x8x4xf32> to vector<8x4xf32>
    %c2 = arith.constant 2 : index
    %c0_4 = arith.constant 0 : index
    %c0_5 = arith.constant 0 : index
    %4 = vector.load %arg2[%c2, %c0_4, %c0_5] : memref<9x8x4xf32, #tpu.memory_space<vmem>>, vector<1x8x4xf32>
    %5 = vector.shape_cast %4 : vector<1x8x4xf32> to vector<8x4xf32>
    %c3 = arith.constant 3 : index
    %c0_6 = arith.constant 0 : index
    %c0_7 = arith.constant 0 : index
    %6 = vector.load %arg2[%c3, %c0_6, %c0_7] : memref<9x8x4xf32, #tpu.memory_space<vmem>>, vector<1x8x4xf32>
    %7 = vector.shape_cast %6 : vector<1x8x4xf32> to vector<8x4xf32>
    %c4 = arith.constant 4 : index
    %c0_8 = arith.constant 0 : index
    %c0_9 = arith.constant 0 : index
    %8 = vector.load %arg2[%c4, %c0_8, %c0_9] : memref<9x8x4xf32, #tpu.memory_space<vmem>>, vector<1x8x4xf32>
    %9 = vector.shape_cast %8 : vector<1x8x4xf32> to vector<8x4xf32>
    %c5 = arith.constant 5 : index
    %c0_10 = arith.constant 0 : index
    %c0_11 = arith.constant 0 : index
    %10 = vector.load %arg2[%c5, %c0_10, %c0_11] : memref<9x8x4xf32, #tpu.memory_space<vmem>>, vector<1x8x4xf32>
    %11 = vector.shape_cast %10 : vector<1x8x4xf32> to vector<8x4xf32>
    %c6 = arith.constant 6 : index
    %c0_12 = arith.constant 0 : index
    %c0_13 = arith.constant 0 : index
    %12 = vector.load %arg2[%c6, %c0_12, %c0_13] : memref<9x8x4xf32, #tpu.memory_space<vmem>>, vector<1x8x4xf32>
    %13 = vector.shape_cast %12 : vector<1x8x4xf32> to vector<8x4xf32>
    %c7 = arith.constant 7 : index
    %c0_14 = arith.constant 0 : index
    %c0_15 = arith.constant 0 : index
    %14 = vector.load %arg2[%c7, %c0_14, %c0_15] : memref<9x8x4xf32, #tpu.memory_space<vmem>>, vector<1x8x4xf32>
    %15 = vector.shape_cast %14 : vector<1x8x4xf32> to vector<8x4xf32>
    %c8 = arith.constant 8 : index
    %c0_16 = arith.constant 0 : index
    %c0_17 = arith.constant 0 : index
    %16 = vector.load %arg2[%c8, %c0_16, %c0_17] : memref<9x8x4xf32, #tpu.memory_space<vmem>>, vector<1x8x4xf32>
    %17 = vector.shape_cast %16 : vector<1x8x4xf32> to vector<8x4xf32>
    %c0_i32 = arith.constant 0 : i32
    %18 = arith.index_cast %c0_i32 : i32 to index
    %c0_18 = arith.constant 0 : index
    %c0_19 = arith.constant 0 : index
    %19 = vector.load %arg1[%18, %c0_18, %c0_19] : memref<1x4x512xf32, #tpu.memory_space<vmem>>, vector<1x4x512xf32>
    %20 = vector.shape_cast %19 : vector<1x4x512xf32> to vector<4x512xf32>
    %21 = vector.extract_strided_slice %20 {offsets = [0, 0], sizes = [4, 384], strides = [1, 1]} : vector<4x512xf32> to vector<4x384xf32>
    %cst = arith.constant dense<0.000000e+00> : vector<8x384xf32>
    %22 = tpu.matmul %1, %21, %cst {dimension_numbers = #tpu.dot_dimension_numbers<[1], [0], [0], [1], [0, 0, 1, 1], [], []>} : vector<8x4xf32>, vector<4x384xf32>, vector<8x384xf32> -> vector<8x384xf32>
    %23 = vector.extract_strided_slice %20 {offsets = [0, 1], sizes = [4, 384], strides = [1, 1]} : vector<4x512xf32> to vector<4x384xf32>
    %cst_20 = arith.constant dense<0.000000e+00> : vector<8x384xf32>
    %24 = tpu.matmul %3, %23, %cst_20 {dimension_numbers = #tpu.dot_dimension_numbers<[1], [0], [0], [1], [0, 0, 1, 1], [], []>} : vector<8x4xf32>, vector<4x384xf32>, vector<8x384xf32> -> vector<8x384xf32>
    %25 = arith.addf %22, %24 : vector<8x384xf32>
    %26 = vector.extract_strided_slice %20 {offsets = [0, 2], sizes = [4, 384], strides = [1, 1]} : vector<4x512xf32> to vector<4x384xf32>
    %cst_21 = arith.constant dense<0.000000e+00> : vector<8x384xf32>
    %27 = tpu.matmul %5, %26, %cst_21 {dimension_numbers = #tpu.dot_dimension_numbers<[1], [0], [0], [1], [0, 0, 1, 1], [], []>} : vector<8x4xf32>, vector<4x384xf32>, vector<8x384xf32> -> vector<8x384xf32>
    %28 = arith.addf %25, %27 : vector<8x384xf32>
    %29 = vector.extract_strided_slice %20 {offsets = [0, 18], sizes = [4, 384], strides = [1, 1]} : vector<4x512xf32> to vector<4x384xf32>
    %cst_22 = arith.constant dense<0.000000e+00> : vector<8x384xf32>
    %30 = tpu.matmul %7, %29, %cst_22 {dimension_numbers = #tpu.dot_dimension_numbers<[1], [0], [0], [1], [0, 0, 1, 1], [], []>} : vector<8x4xf32>, vector<4x384xf32>, vector<8x384xf32> -> vector<8x384xf32>
    %31 = arith.addf %28, %30 : vector<8x384xf32>
    %32 = vector.extract_strided_slice %20 {offsets = [0, 19], sizes = [4, 384], strides = [1, 1]} : vector<4x512xf32> to vector<4x384xf32>
    %cst_23 = arith.constant dense<0.000000e+00> : vector<8x384xf32>
    %33 = tpu.matmul %9, %32, %cst_23 {dimension_numbers = #tpu.dot_dimension_numbers<[1], [0], [0], [1], [0, 0, 1, 1], [], []>} : vector<8x4xf32>, vector<4x384xf32>, vector<8x384xf32> -> vector<8x384xf32>
    %34 = arith.addf %31, %33 : vector<8x384xf32>
    %35 = vector.extract_strided_slice %20 {offsets = [0, 20], sizes = [4, 384], strides = [1, 1]} : vector<4x512xf32> to vector<4x384xf32>
    %cst_24 = arith.constant dense<0.000000e+00> : vector<8x384xf32>
    %36 = tpu.matmul %11, %35, %cst_24 {dimension_numbers = #tpu.dot_dimension_numbers<[1], [0], [0], [1], [0, 0, 1, 1], [], []>} : vector<8x4xf32>, vector<4x384xf32>, vector<8x384xf32> -> vector<8x384xf32>
    %37 = arith.addf %34, %36 : vector<8x384xf32>
    %38 = vector.extract_strided_slice %20 {offsets = [0, 36], sizes = [4, 384], strides = [1, 1]} : vector<4x512xf32> to vector<4x384xf32>
    %cst_25 = arith.constant dense<0.000000e+00> : vector<8x384xf32>
    %39 = tpu.matmul %13, %38, %cst_25 {dimension_numbers = #tpu.dot_dimension_numbers<[1], [0], [0], [1], [0, 0, 1, 1], [], []>} : vector<8x4xf32>, vector<4x384xf32>, vector<8x384xf32> -> vector<8x384xf32>
    %40 = arith.addf %37, %39 : vector<8x384xf32>
    %41 = vector.extract_strided_slice %20 {offsets = [0, 37], sizes = [4, 384], strides = [1, 1]} : vector<4x512xf32> to vector<4x384xf32>
    %cst_26 = arith.constant dense<0.000000e+00> : vector<8x384xf32>
    %42 = tpu.matmul %15, %41, %cst_26 {dimension_numbers = #tpu.dot_dimension_numbers<[1], [0], [0], [1], [0, 0, 1, 1], [], []>} : vector<8x4xf32>, vector<4x384xf32>, vector<8x384xf32> -> vector<8x384xf32>
    %43 = arith.addf %40, %42 : vector<8x384xf32>
    %44 = vector.extract_strided_slice %20 {offsets = [0, 38], sizes = [4, 384], strides = [1, 1]} : vector<4x512xf32> to vector<4x384xf32>
    %cst_27 = arith.constant dense<0.000000e+00> : vector<8x384xf32>
    %45 = tpu.matmul %17, %44, %cst_27 {dimension_numbers = #tpu.dot_dimension_numbers<[1], [0], [0], [1], [0, 0, 1, 1], [], []>} : vector<8x4xf32>, vector<4x384xf32>, vector<8x384xf32> -> vector<8x384xf32>
    %46 = arith.addf %43, %45 : vector<8x384xf32>
    %47 = arith.index_cast %c0_i32 : i32 to index
    %c0_28 = arith.constant 0 : index
    %c0_29 = arith.constant 0 : index
    %48 = vector.load %arg3[%47, %c0_28, %c0_29] : memref<1x8x384xf32, #tpu.memory_space<vmem>>, vector<1x8x384xf32>
    %49 = vector.shape_cast %48 : vector<1x8x384xf32> to vector<8x384xf32>
    %50 = vector.shape_cast %46 : vector<8x384xf32> to vector<1x8x384xf32>
    tpu.vector_store %arg3[%47, %c0_28, %c0_29], %50 {strides = array<i32>} : memref<1x8x384xf32, #tpu.memory_space<vmem>>, vector<1x8x384xf32>,
    %c1_i32 = arith.constant 1 : i32
    return
  }
  func.func @transform_0(%arg0: i32) -> (i32, i32, i32) {
    %c0_i32 = arith.constant 0 : i32
    %c0_i32_0 = arith.constant 0 : i32
    %c0_i32_1 = arith.constant 0 : i32
    return %arg0, %c0_i32, %c0_i32_0 : i32, i32, i32
  }
  func.func @transform_1(%arg0: i32) -> (i32, i32, i32) {
    %c0_i32 = arith.constant 0 : i32
    %c0_i32_0 = arith.constant 0 : i32
    %c0_i32_1 = arith.constant 0 : i32
    %c0_i32_2 = arith.constant 0 : i32
    return %c0_i32, %c0_i32_0, %c0_i32_1 : i32, i32, i32
  }
  func.func @transform_2(%arg0: i32) -> (i32, i32, i32) {
    %c0_i32 = arith.constant 0 : i32
    %c0_i32_0 = arith.constant 0 : i32
    %c0_i32_1 = arith.constant 0 : i32
    return %arg0, %c0_i32, %c0_i32_0 : i32, i32, i32
  }
}

</mosaic_0001>

<bundles_post_ra>
// kernel: tpu_custom_call.1
= control target key start
LH: loop header
LB: loop body
LE: loop exit
PB: predicated region body
PF: predicated region fallthrough
CT: control target
= control target key end

     0   :  { %7 = vsyncpa [#allocation3], 0  ;;  %s2249_s0 = inlined_call_operand.vmem [shape: f32[2,4,512], index: 0, kind: input, shape index: {}]   ;;  %s2250_s1 = inlined_call_operand.vmem [shape: f32[9,8,4], index: 1, kind: input, shape index: {}]   ;;  %s2251_s2 = inlined_call_operand.hbm [shape: f32[2,8,384], index: 2, kind: output, shape index: {}]  }
   0x1   :  { %9 = vsyncpa [#allocation3 + $0x1], 0  ;;  %s2012_s9 = smov 0   ;;  %s2014_s10 = smov 0  }
   0x2   :  { %s2016_s11 = smov 0   ;;  %s2018_s12 = smov 0  }
   0x3 LB: > { %s2033_s13 = sadd.s32 4294967295, %s1984_s12   ;;  %s1711_s14 = sadd.s32 4294967294, %s1984_s12   ;;  %s1984_s12 = sphi %s2018_s12, %s2257_s12   ;;  %s1980_s11 = sphi %s2016_s11, %s2256_s11   ;;  %s1976_s10 = sphi %s2014_s10, %s2255_s10   ;;  %s1972_s9 = sphi %s2012_s9, %s2254_s9  }
   0x4   : > { %s2037_s15 = sadd.s32 1, %s1984_s12   ;;  %s69_s16 = sadd.s32 1, %s1980_s11 }
   0x5   : > { %s66_s17 = ssub.s32 %s1984_s12, %s2037_s15  ;;  %p79_p0 = scmp.ne.s32.totalorder %s1980_s11, %s1976_s10 }
   0x6   : > { %p67_p1 = scmp.eq.s32.totalorder %s66_s17, 0  ;;  %p80_p2 = scmp.eq.s32.totalorder %s2033_s13, 1 }
   0x7   : > { %p85_p3 = scmp.ne.s32.totalorder %s1976_s10, %s1972_s9  ;;  %p86_p4 = scmp.eq.s32.totalorder %s1711_s14, 1 }
   0x8   : > { %s2048_s18 = scalar_select %p67_p1, %s1980_s11, %s69_s16  }
   0x9   : > { %p2050_p5 = por %p80_p2, %p79_p0  ;;  %p2054_p6 = por %p86_p4, %p85_p3 }
   0xa   : > { %p1714_p7 = scmp.ge.s32.totalorder %s1984_s12, 1  ;;  %p115_p8 = scmp.lt.s32.totalorder %s1984_s12, 3 }
   0xc   : > { %p116_p9 = pnand %p1714_p7, %p115_p8 }
   0xd   : > { %p137_p10 = scmp.lt.s32.totalorder (!%p116_p9), %s2033_s13, 1  ;;  %v1986_v0 = vmov (!%p116_p9), 0.0   ;;  %vm1987_vm0 = vmmov (!%p116_p9), 0   ;;  %s1988_s26 = smov (!%p116_p9), 127   ;;  %vm173_vm1 = vcmask (!%p116_p9), 1039360   ;;  %vm181_vm2 = vcmask (!%p116_p9), 1043456  }
   0xe   : > { %119 = sbr.rel (%p116_p9) target bundleno = 441 (0x1b9), region = 28  ;;  %1792 = vmatprep.subr.mxu1 (!%p116_p9), %v1986_v0  ;;  %1794 = vmatprep.mubr.msk.f32.mxu1 (!%p116_p9), %vm1987_vm0, %v1986_v0  ;;  %s1989_s27 = smov (!%p116_p9), 126   ;;  %v1717_v9 = vld [vmem:[%s2250_s1 + $0x8] sm:$0xff] (!%p116_p9)  ;;  %vm177_vm3 = vcmask (!%p116_p9), 31744   ;;  %vm487_vm4 = vcmask (!%p116_p9), 1031168   ;;  %v142_v18 = vld [vmem:[%s2250_s1] sm:$0xff] (!%p116_p9) }
   0xf   : > { %252 = vmatprep.mubr.f32.mxu0 (!%p116_p9), %v1986_v0  ;;  %s1990_s28 = smov (!%p116_p9), 110   ;;  %s1991_s29 = smov (!%p116_p9), 109   ;;  %vm652_vm5 = vcmask (!%p116_p9), 900096   ;;  %v1718_v26 = vld [vmem:[%s2250_s1 + $0x10] sm:$0xff] (!%p116_p9)  ;;  %vm817_vm6 = vcmask (!%p116_p9), 891904   ;;  %v1719_v34 = vld [vmem:[%s2250_s1 + $0x18] sm:$0xff] (!%p116_p9) }
  0x10   : > { %s1992_s30 = smov (!%p116_p9), 108   ;;  %s1993_s3 = smov (!%p116_p9), 92   ;;  %vm982_vm7 = vcmask (!%p116_p9), 883712   ;;  %v1720_v42 = vld [vmem:[%s2250_s1 + $0x20] sm:$0xff] (!%p116_p9)  ;;  %vm1147_vm8 = vcmask (!%p116_p9), 752640   ;;  %v1721_v50 = vld [vmem:[%s2250_s1 + $0x28] sm:$0xff] (!%p116_p9) }
  0x11   : > { %s1994_s4 = smov (!%p116_p9), 91   ;;  %s1995_s5 = smov (!%p116_p9), 90   ;;  %vm1312_vm9 = vcmask (!%p116_p9), 744448   ;;  %v1722_v58 = vld [vmem:[%s2250_s1 + $0x30] sm:$0xff] (!%p116_p9)  ;;  %vm1477_vm10 = vcmask (!%p116_p9), 736256  }
  0x12   : > { %s1870_s7 = smul.u32 (!%p116_p9), 384, %s2033_s13  ;;  %s1996_s23 = smov (!%p116_p9), [#allocation2]  }
  0x13   : > { %s1926_s24 = sshll.u32 (!%p116_p9), %s1996_s23, 4  ;;  %s1927_s24 = int_to_ptr.vmem [resolvable:$false] %s1926_s24 }
  0x15   : > { %s138_s21 = scalar_select %p137_p10, %s2033_s13, 1 }
  0x17   : > { %s1773_s22 = sshll.u32 %s138_s21, 4  ;;  %s2207_s21 = scalar_lea.hbm %s2251_s2, %s1870_s7 }
  0x18   : > { %s141_s25 = scalar_lea.vmem %s2249_s0, %s1773_s22 }
  0x19   : > { %v2069_v1 = vld [vmem:[%s141_s25] sm:$0xff]  ;;  %v2071_v2 = vld [vmem:[%s141_s25 + $0x8] sm:$0xff]  ;;  %s1928_s25 = scalar_lea.vmem %s1927_s24, 768 }
  0x1a   : > { %165 = vrot.lane.b32.xlu1 %v2069_v1, %s1988_s26  ;;  %v163_v3 = vcombine.high %v2069_v1, %v2069_v1  ;;  %v164_v4 = vcombine.high %v2071_v2, %v2071_v2 }
  0x1c   : > { %167 = vrot.lane.b32.xlu0 %v163_v3, %s1988_s26 }
  0x1e   : > { %171 = vrot.lane.b32.xlu1 %v164_v4, %s1988_s26 }
  0x20   : > { %169 = vrot.lane.b32.xlu0 %v2071_v2, %s1988_s26 }
  0x22   : > { %483 = vrot.lane.b32.xlu1 %v2071_v2, %s1989_s27 }
  0x24   : > { %481 = vrot.lane.b32.xlu0 %v163_v3, %s1989_s27 }
  0x26   : > { %485 = vrot.lane.b32.xlu1 %v164_v4, %s1989_s27 }
  0x28   : > { %479 = vrot.lane.b32.xlu0 %v2069_v1, %s1989_s27 }
  0x2a   : > { %648 = vrot.lane.b32.xlu1 %v2071_v2, %s1990_s28 }
  0x2c   : > { %646 = vrot.lane.b32.xlu0 %v163_v3, %s1990_s28 }
  0x2e   : > { %650 = vrot.lane.b32.xlu1 %v164_v4, %s1990_s28 }
  0x30   : > { %644 = vrot.lane.b32.xlu0 %v2069_v1, %s1990_s28 }
  0x32   : > { %813 = vrot.lane.b32.xlu1 %v2071_v2, %s1991_s29 }
  0x34   : > { %811 = vrot.lane.b32.xlu0 %v163_v3, %s1991_s29 }
  0x36   : > { %815 = vrot.lane.b32.xlu1 %v164_v4, %s1991_s29 }
  0x38   : > { %809 = vrot.lane.b32.xlu0 %v2069_v1, %s1991_s29 }
  0x3a   : > { %978 = vrot.lane.b32.xlu1 %v2071_v2, %s1992_s30 }
  0x3c   : > { %976 = vrot.lane.b32.xlu0 %v163_v3, %s1992_s30 }
  0x3e   : > { %980 = vrot.lane.b32.xlu1 %v164_v4, %s1992_s30 }
  0x40   : > { %974 = vrot.lane.b32.xlu0 %v2069_v1, %s1992_s30 }
  0x42   : > { %1143 = vrot.lane.b32.xlu1 %v2071_v2, %s1993_s3 }
  0x44   : > { %1141 = vrot.lane.b32.xlu0 %v163_v3, %s1993_s3 }
  0x46   : > { %1145 = vrot.lane.b32.xlu1 %v164_v4, %s1993_s3 }
  0x48   : > { %1139 = vrot.lane.b32.xlu0 %v2069_v1, %s1993_s3 }
  0x4a   : > { %1308 = vrot.lane.b32.xlu1 %v2071_v2, %s1994_s4 }
  0x4c   : > { %1306 = vrot.lane.b32.xlu0 %v163_v3, %s1994_s4 }
  0x4e   : > { %1310 = vrot.lane.b32.xlu1 %v164_v4, %s1994_s4 }
  0x50   : > { %1304 = vrot.lane.b32.xlu0 %v2069_v1, %s1994_s4 }
  0x52   : > { %1473 = vrot.lane.b32.xlu1 %v2071_v2, %s1995_s5 }
  0x54   : > { %1471 = vrot.lane.b32.xlu0 %v163_v3, %s1995_s5 }
  0x56   : > { %1475 = vrot.lane.b32.xlu1 %v164_v4, %s1995_s5 }
  0x58   : > { %1469 = vrot.lane.b32.xlu0 %v2069_v1, %s1995_s5  ;;  %s134_s5 = sand.u32 1, %s1976_s10  }
  0x59   : > { %s1869_s6 = smul.u32 24, %s134_s5  ;;  %s1638_s13 = scalar_lea.sflag [#allocation3], %s134_s5 }
  0x5b   : > { %s136_s8 = scalar_lea.vmem [#allocation2], %s1869_s6 }
  0x5c   : > { %s1652_s14 = sshll.u32 %s136_s8, 4  ;;  %s2209_s14 = int_to_ptr.vmem [resolvable:$true] %s1652_s14 }
  0x5d   : > { %s1922_s22 = scalar_lea.vmem %s2209_s14, 384  ;;  %p1929_p0 = scmp.lt.s32.totalorder %s2209_s14, %s1927_s24 }
  0x5e   : > { %p1923_p11 = scmp.ne.s32.totalorder %s2209_s14, %s1922_s22  ;;  %p1930_p1 = scmp.lt.s32.totalorder %s1928_s25, %s1922_s22 }
  0x60   : > { %p1924_p12 = pnand %p1923_p11, %p2050_p5  ;;  %p1931_p2 = por %p1930_p1, %p1929_p0 }
  0x62   : > { %p1925_p13 = pneg %p1924_p12 }
  0x64   : > { %p1932_p3 = pnand %p1931_p2, %p1925_p13 }
  0x8c   : > { %v166_v5 = vpop.permute.xlu1 %165 }
  0x8e   : > { %v168_v6 = vpop.permute.xlu0 %167 }
  0x8f   : > { %v174_v12 = vsel %vm173_vm1, %v166_v5, %v168_v6 }
  0x90   : > { %v172_v7 = vpop.permute.xlu1 %171 }
  0x92   : > { %v170_v8 = vpop.permute.xlu0 %169 }
  0x93   : > { %v175_v10 = vsel %vm173_vm1, %v168_v6, %v170_v8  ;;  %v176_v11 = vsel %vm173_vm1, %v170_v8, %v172_v7  ;;  %v1724_v6 = vld [vmem:[%s2250_s1 + $0x40] sm:$0xff] }
  0x94   : > { %1725 = vmatprep.subr.msk.mxu0 %vm181_vm2, %v175_v10  ;;  %1793 = vmatpush3.msk.msra.mxu1 %vm181_vm2, %v176_v11  ;;  %v484_v13 = vpop.permute.xlu1 %483 }
  0x95   : > { %1726 = vmatpush1.msk.msra.mxu0 %vm181_vm2, %v174_v12  ;;  %1795 = vmatmul.mubr.msk.f32.vlgmr.msra.gmra.mrb[0].mxu1 %vm177_vm3, %v1717_v9 }
  0x96   : > { %1727 = vmatmul.mubr.msk.f32.vlgmr.msra.gmra.mrb[0].mxu0 %vm177_vm3, %v1717_v9  ;;  %1730 = vmatprep.subr.msk.mxu0 %vm181_vm2, %v163_v3  ;;  %v482_v14 = vpop.permute.xlu0 %481  ;;  %v1723_v3 = vld [vmem:[%s2250_s1 + $0x38] sm:$0xff] }
  0x97   : > { %v489_v15 = vsel %vm487_vm4, %v482_v14, %v484_v13  ;;  %1731 = vmatpush1.msk.msra.mxu0 %vm181_vm2, %v2069_v1  ;;  %1797 = vmatprep.subr.mxu1 %v1986_v0 }
  0x98   : > { %1798 = vmatpush3.msk.msra.mxu1 %vm181_vm2, %v2071_v2  ;;  %v486_v16 = vpop.permute.xlu1 %485  ;;  %1735 = vmatprep.subr.msk.mxu0 %vm181_vm2, %v489_v15 }
  0x99   : > { %1799 = vmatprep.mubr.msk.f32.mxu1 %vm1987_vm0, %v1986_v0  ;;  %1802 = vmatprep.subr.mxu1 %v1986_v0  ;;  %v490_v19 = vsel %vm487_vm4, %v484_v13, %v486_v16 }
  0x9a   : > { %v480_v17 = vpop.permute.xlu0 %479  ;;  %402 = vmatprep.mubr.f32.mxu0 %v1986_v0 }
  0x9b   : > { %v488_v20 = vsel %vm487_vm4, %v480_v17, %v482_v14 }
  0x9c   : > { %v649_v21 = vpop.permute.xlu1 %648 }
  0x9d   : > { %1800 = vmatmul.mubr.msk.f32.vlgmr.msra.gmra.mrb[0].mxu1 %vm177_vm3, %v142_v18 }
  0x9e   : > { %1803 = vmatpush3.msk.msra.mxu1 %vm181_vm2, %v490_v19  ;;  %1732 = vmatmul.mubr.msk.f32.vlgmr.msra.gmra.mrb[0].mxu0 %vm177_vm3, %v142_v18  ;;  %v647_v22 = vpop.permute.xlu0 %646 }
  0x9f   : > { %1736 = vmatpush1.msk.msra.mxu0 %vm181_vm2, %v488_v20  ;;  %v654_v23 = vsel %vm652_vm5, %v647_v22, %v649_v21  ;;  %1804 = vmatprep.mubr.msk.f32.mxu1 %vm1987_vm0, %v1986_v0 }
  0xa0   : > { %v651_v24 = vpop.permute.xlu1 %650  ;;  %1740 = vmatprep.subr.msk.mxu0 %vm181_vm2, %v654_v23  ;;  %1807 = vmatprep.subr.mxu1 %v1986_v0 }
  0xa1   : > { %564 = vmatprep.mubr.f32.mxu0 %v1986_v0  ;;  %v655_v27 = vsel %vm652_vm5, %v649_v21, %v651_v24 }
  0xa2   : > { %v645_v25 = vpop.permute.xlu0 %644 }
  0xa3   : > { %v653_v28 = vsel %vm652_vm5, %v645_v25, %v647_v22 }
  0xa4   : > { %v814_v29 = vpop.permute.xlu1 %813 }
  0xa5   : > { %1805 = vmatmul.mubr.msk.f32.vlgmr.msra.gmra.mrb[0].mxu1 %vm177_vm3, %v1718_v26 }
  0xa6   : > { %1808 = vmatpush3.msk.msra.mxu1 %vm181_vm2, %v655_v27  ;;  %1737 = vmatmul.mubr.msk.f32.vlgmr.msra.gmra.mrb[0].mxu0 %vm177_vm3, %v1718_v26  ;;  %v812_v30 = vpop.permute.xlu0 %811 }
  0xa7   : > { %1741 = vmatpush1.msk.msra.mxu0 %vm181_vm2, %v653_v28  ;;  %v819_v31 = vsel %vm817_vm6, %v812_v30, %v814_v29  ;;  %1809 = vmatprep.mubr.msk.f32.mxu1 %vm1987_vm0, %v1986_v0 }
  0xa8   : > { %v816_v32 = vpop.permute.xlu1 %815  ;;  %1745 = vmatprep.subr.msk.mxu0 %vm181_vm2, %v819_v31  ;;  %1812 = vmatprep.subr.mxu1 %v1986_v0 }
  0xa9   : > { %729 = vmatprep.mubr.f32.mxu0 %v1986_v0  ;;  %v820_v35 = vsel %vm817_vm6, %v814_v29, %v816_v32 }
  0xaa   : > { %v810_v33 = vpop.permute.xlu0 %809 }
  0xab   : > { %v818_v36 = vsel %vm817_vm6, %v810_v33, %v812_v30 }
  0xac   : > { %v979_v37 = vpop.permute.xlu1 %978 }
  0xad   : > { %1810 = vmatmul.mubr.msk.f32.vlgmr.msra.gmra.mrb[0].mxu1 %vm177_vm3, %v1719_v34 }
  0xae   : > { %1813 = vmatpush3.msk.msra.mxu1 %vm181_vm2, %v820_v35  ;;  %1742 = vmatmul.mubr.msk.f32.vlgmr.msra.gmra.mrb[0].mxu0 %vm177_vm3, %v1719_v34  ;;  %v977_v38 = vpop.permute.xlu0 %976 }
  0xaf   : > { %1746 = vmatpush1.msk.msra.mxu0 %vm181_vm2, %v818_v36  ;;  %v984_v39 = vsel %vm982_vm7, %v977_v38, %v979_v37  ;;  %1814 = vmatprep.mubr.msk.f32.mxu1 %vm1987_vm0, %v1986_v0 }
  0xb0   : > { %v981_v40 = vpop.permute.xlu1 %980  ;;  %1750 = vmatprep.subr.msk.mxu0 %vm181_vm2, %v984_v39  ;;  %1817 = vmatprep.subr.mxu1 %v1986_v0 }
  0xb1   : > { %894 = vmatprep.mubr.f32.mxu0 %v1986_v0  ;;  %v985_v43 = vsel %vm982_vm7, %v979_v37, %v981_v40 }
  0xb2   : > { %v975_v41 = vpop.permute.xlu0 %974 }
  0xb3   : > { %v983_v44 = vsel %vm982_vm7, %v975_v41, %v977_v38 }
  0xb4   : > { %v1144_v45 = vpop.permute.xlu1 %1143 }
  0xb5   : > { %1815 = vmatmul.mubr.msk.f32.vlgmr.msra.gmra.mrb[0].mxu1 %vm177_vm3, %v1720_v42 }
  0xb6   : > { %1818 = vmatpush3.msk.msra.mxu1 %vm181_vm2, %v985_v43  ;;  %1747 = vmatmul.mubr.msk.f32.vlgmr.msra.gmra.mrb[0].mxu0 %vm177_vm3, %v1720_v42  ;;  %v1142_v46 = vpop.permute.xlu0 %1141 }
  0xb7   : > { %1751 = vmatpush1.msk.msra.mxu0 %vm181_vm2, %v983_v44  ;;  %v1149_v47 = vsel %vm1147_vm8, %v1142_v46, %v1144_v45  ;;  %1819 = vmatprep.mubr.msk.f32.mxu1 %vm1987_vm0, %v1986_v0 }
  0xb8   : > { %v1146_v48 = vpop.permute.xlu1 %1145  ;;  %1755 = vmatprep.subr.msk.mxu0 %vm181_vm2, %v1149_v47  ;;  %1822 = vmatprep.subr.mxu1 %v1986_v0 }
  0xb9   : > { %1059 = vmatprep.mubr.f32.mxu0 %v1986_v0  ;;  %v1150_v51 = vsel %vm1147_vm8, %v1144_v45, %v1146_v48 }
  0xba   : > { %v1140_v49 = vpop.permute.xlu0 %1139 }
  0xbb   : > { %v1148_v52 = vsel %vm1147_vm8, %v1140_v49, %v1142_v46 }
  0xbc   : > { %v1309_v53 = vpop.permute.xlu1 %1308 }
  0xbd   : > { %1820 = vmatmul.mubr.msk.f32.vlgmr.msra.gmra.mrb[0].mxu1 %vm177_vm3, %v1721_v50 }
  0xbe   : > { %1823 = vmatpush3.msk.msra.mxu1 %vm181_vm2, %v1150_v51  ;;  %1752 = vmatmul.mubr.msk.f32.vlgmr.msra.gmra.mrb[0].mxu0 %vm177_vm3, %v1721_v50  ;;  %v1307_v54 = vpop.permute.xlu0 %1306 }
  0xbf   : > { %1756 = vmatpush1.msk.msra.mxu0 %vm181_vm2, %v1148_v52  ;;  %v1314_v55 = vsel %vm1312_vm9, %v1307_v54, %v1309_v53  ;;  %1824 = vmatprep.mubr.msk.f32.mxu1 %vm1987_vm0, %v1986_v0 }
  0xc0   : > { %v1311_v56 = vpop.permute.xlu1 %1310  ;;  %1760 = vmatprep.subr.msk.mxu0 %vm181_vm2, %v1314_v55  ;;  %1827 = vmatprep.subr.mxu1 %v1986_v0 }
  0xc1   : > { %1224 = vmatprep.mubr.f32.mxu0 %v1986_v0  ;;  %v1315_v59 = vsel %vm1312_vm9, %v1309_v53, %v1311_v56 }
  0xc2   : > { %v1305_v57 = vpop.permute.xlu0 %1304 }
  0xc3   : > { %v1313_v60 = vsel %vm1312_vm9, %v1305_v57, %v1307_v54 }
  0xc4   : > { %v1474_v61 = vpop.permute.xlu1 %1473 }
  0xc5   : > { %1825 = vmatmul.mubr.msk.f32.vlgmr.msra.gmra.mrb[0].mxu1 %vm177_vm3, %v1722_v58 }
  0xc6   : > { %1828 = vmatpush3.msk.msra.mxu1 %vm181_vm2, %v1315_v59  ;;  %1757 = vmatmul.mubr.msk.f32.vlgmr.msra.gmra.mrb[0].mxu0 %vm177_vm3, %v1722_v58  ;;  %v1472_v62 = vpop.permute.xlu0 %1471 }
  0xc7   : > { %1761 = vmatpush1.msk.msra.mxu0 %vm181_vm2, %v1313_v60  ;;  %v1479_v63 = vsel %vm1477_vm10, %v1472_v62, %v1474_v61  ;;  %1829 = vmatprep.mubr.msk.f32.mxu1 %vm1987_vm0, %v1986_v0 }
  0xc8   : > { %v1476_v1 = vpop.permute.xlu1 %1475  ;;  %1765 = vmatprep.subr.msk.mxu0 %vm181_vm2, %v1479_v63  ;;  %1832 = vmatprep.subr.mxu1 %v1986_v0 }
  0xc9   : > { %1389 = vmatprep.mubr.f32.mxu0 %v1986_v0  ;;  %v1480_v4 = vsel %vm1477_vm10, %v1474_v61, %v1476_v1 }
  0xca   : > { %v1470_v2 = vpop.permute.xlu0 %1469 }
  0xcb   : > { %v1478_v5 = vsel %vm1477_vm10, %v1470_v2, %v1472_v62 }
  0xcd   : > { %1830 = vmatmul.mubr.msk.f32.vlgmr.msra.gmra.mrb[0].mxu1 %vm177_vm3, %v1723_v3 }
  0xce   : > { %1833 = vmatpush3.msk.msra.mxu1 %vm181_vm2, %v1480_v4  ;;  %1762 = vmatmul.mubr.msk.f32.vlgmr.msra.gmra.mrb[0].mxu0 %vm177_vm3, %v1723_v3 }
  0xcf   : > { %1766 = vmatpush1.msk.msra.mxu0 %vm181_vm2, %v1478_v5  ;;  %1834 = vmatprep.mubr.msk.f32.mxu1 %vm1987_vm0, %v1986_v0 }
  0xd0   : > { %1554 = vmatprep.mubr.f32.mxu0 %v1986_v0 }
  0xd5   : > { %1835 = vmatmul.mubr.msk.f32.vlgmr.msra.gmra.mrb[0].mxu1 %vm177_vm3, %v1724_v6 }
  0xd6   : > { %1767 = vmatmul.mubr.msk.f32.vlgmr.msra.gmra.mrb[0].mxu0 %vm177_vm3, %v1724_v6 }
 0x1a8   : > { %v1627_v7 = vpop.f32.mrb[0].mxu1 }
 0x1a9   : > { %1636 = vst [vmem:[%s136_s8 + $0x10] sm:$0xff] %v1627_v7  ;;  %v1556_v8 = vpop.f32.mrb[0].mxu0  ;;  %v1836_v9 = vpop.f32.mrb[1].mxu1 }
 0x1aa   : > { %1634 = vst [vmem:[%s136_s8] sm:$0xff] %v1556_v8  ;;  %v1558_v0 = vpop.f32.mrb[1].mxu0 }
 0x1ab   : > { %1635 = vst [vmem:[%s136_s8 + $0x8] sm:$0xff] %v1558_v0 }
 0x1ac   : > { %1935 = shalt.err (!%p1932_p3)
}
 0x1ad   : > { %s1936_s26 = scalar_lea.hbm %s2207_s21, 384  ;;  %s1940_s29 = scalar_lea.hbm %s2251_s2, 768 }
 0x1ae   : > { %p1937_p4 = scmp.ne.s32.totalorder %s2207_s21, %s1936_s26  ;;  %p1941_p9 = scmp.lt.u32.totalorder %s2207_s21, %s2251_s2 }
 0x1af   : > { %p1942_p10 = scmp.lt.u32.totalorder %s1940_s29, %s1936_s26  ;;  %p1944_p12 = scmp.lt.u32.totalorder %s1936_s26, %s2207_s21 }
 0x1b0   : > { %p1938_p7 = pnand %p1937_p4, %p2050_p5 }
 0x1b1   : > { %p1943_p11 = por %p1942_p10, %p1941_p9 }
 0x1b2   : > { %p1939_p8 = pneg %p1938_p7 }
 0x1b3   : > { %p1945_p13 = por %p1944_p12, %p1943_p11 }
 0x1b5   : > { %p1946_p0 = pnand %p1945_p13, %p1939_p8 }
 0x1b7   : > { %1949 = shalt.err (!%p1946_p0)
}
 0x1b8   : > { %1871 = dma.vmem_to_hbm [thread:$0]  (%p2050_p5), %s2209_s14, 384, %s2207_s21, %s1638_s13  }
 0x1b9 PF: > { %p1877_p1 = scmp.ge.s32.totalorder %s1984_s12, 2  ;;  %s1664_s4 = sand.u32 1, %s1972_s9  }
 0x1ba   : > { %s1665_s5 = scalar_lea.sflag [#allocation3], %s1664_s4 }
 0x1bb   : > { %p1874_p2 = pnand %p1877_p1, %p2054_p6 }
 0x1bd   : > { %1967 = dma.done.wait (!%p1874_p2), %s1665_s5, 384  }
 0x1be   : > { %1969 = vsyncadd (!%p1874_p2), %s1665_s5, 4294966912  ;;  %p12_p3 = scmp.ge.s32.totalorder %s2037_s15, 4   ;;  %s2254_s9 = smov %s1976_s10 }
 0x1bf   : > { %s2255_s10 = smov %s1980_s11  ;;  %s2256_s11 = smov %s2048_s18 }
 0x1c0   : > { %s2257_s12 = smov %s2037_s15  ;;  %14 = sbr.rel (!%p12_p3) target bundleno = 3 (0x3), region = 71 }
 0x1c7   :  { %1670 = vsyncpa [#allocation3], 1 }
 0x1c8   :  { %1672 = vsyncpa [#allocation3 + $0x1], 1 }

</bundles_post_ra>
